<compile_context>
chip_gen: v5e
topology: v5e:2x2
jax: 0.10.0
libtpu: 0.0.40
codegen_flags: <defaults>
</compile_context>

<pallas_src>
import functools

import jax
import jax.numpy as jnp
from jax.experimental import pallas as pl
from jax.experimental.pallas import tpu as pltpu

C = 128  # fixed by the module: Conv(128, 128, 1)


def _glau_kernel(t_ref, c_ref, wt_ref, scale_ref, shift_ref, o_ref):
    # t_ref/c_ref/o_ref blocks: (B_N, C, HWp)
    # wt_ref: (C_in, C_out)  (conv weight, transposed in the wrapper)
    # scale_ref/shift_ref: (1, C)  (BN affine + conv bias, 1/HW folded into scale)

    # Global average pool as a spatial SUM (the 1/HW factor lives in scale).
    # Zero padding of the spatial axis does not perturb the sum.
    gap = jnp.sum(t_ref[...], axis=2, dtype=jnp.float32)                # (B_N, C)

    # 1x1 conv over channels: y[b, co] = sum_ci gap[b, ci] * W[co, ci]
    y = jnp.dot(gap, wt_ref[...], preferred_element_type=jnp.float32)   # (B_N, C)

    # Folded conv-bias + BatchNorm (eval mode) affine, then sigmoid gate.
    gate = jax.nn.sigmoid(y * scale_ref[...] + shift_ref[...])          # (B_N, C)
    gate = gate[:, :, None].astype(o_ref.dtype)                         # (B_N, C, 1)

    # out = t * gate * c  (gate broadcasts over the spatial/lane axis)
    o_ref[...] = t_ref[...] * gate * c_ref[...]


@functools.partial(jax.jit, static_argnames=())
def glau_block(t, c, w, scale, shift):
    """t, c: (N, C, H, W) float32. w: (C_out, C_in). scale/shift: (C, 1).

    Returns (N, C, H, W) = t * sigmoid(BN(Conv1x1(GAP(t)))) * c.
    """
    N, Cin, H, W = t.shape
    assert Cin == C
    HW = H * W

    # Lane-dense spatial: pad HW up to a multiple of 128.
    HWp = ((HW + 127) // 128) * 128
    t2 = t.reshape(N, C, HW)
    c2 = c.reshape(N, C, HW)
    if HWp != HW:
        pad = ((0, 0), (0, 0), (0, HWp - HW))
        t2 = jnp.pad(t2, pad)
        c2 = jnp.pad(c2, pad)

    # Fold the 1/HW of the mean into the BN scale (true HW, not padded) so the
    # kernel can use a pure sum-reduce for the GAP.
    scale_eff = (scale.reshape(C) / float(HW)).reshape(1, C)
    shift_eff = shift.reshape(1, C)
    w_t = w.T  # (C_in, C_out) so that gap @ w_t == (W @ gap^T)^T

    # --- batch tiling: ~4 MiB payload per array per step, but keep the grid
    # length >= 2 when possible so both v7x TensorCores get work.
    itemsize = jnp.dtype(t.dtype).itemsize
    per_sample_bytes = C * HWp * itemsize
    target_bn = max(1, (4 * 1024 * 1024) // per_sample_bytes)
    cap = N if N < 2 else max(1, min(target_bn, N // 2))
    bn = 1
    for d in range(1, N + 1):
        if N % d == 0 and d <= cap:
            bn = d
    grid_n = N // bn

    # Explicit VMEM budget: t, c, out blocks (double-buffered) + weights + headroom.
    vmem_bytes = 3 * 2 * bn * per_sample_bytes + (C * C + 2 * C) * 4 + (2 << 20)
    vmem_bytes = int(min(max(vmem_bytes, 8 << 20), 48 << 20))

    out = pl.pallas_call(
        _glau_kernel,
        out_shape=jax.ShapeDtypeStruct((N, C, HWp), t.dtype),
        grid_spec=pltpu.PrefetchScalarGridSpec(
            num_scalar_prefetch=0,
            grid=(grid_n,),
            in_specs=[
                pl.BlockSpec((bn, C, HWp), lambda n: (n, 0, 0)),   # t
                pl.BlockSpec((bn, C, HWp), lambda n: (n, 0, 0)),   # c
                pl.BlockSpec((C, C), lambda n: (0, 0)),            # conv weight (transposed)
                pl.BlockSpec((1, C), lambda n: (0, 0)),            # BN scale (/HW folded)
                pl.BlockSpec((1, C), lambda n: (0, 0)),            # BN shift
            ],
            out_specs=pl.BlockSpec((bn, C, HWp), lambda n: (n, 0, 0)),
        ),
        compiler_params=pltpu.CompilerParams(
            dimension_semantics=("parallel",),
            vmem_limit_bytes=vmem_bytes,
        ),
    )(t2, c2, w_t, scale_eff, shift_eff)

    if HWp != HW:
        out = out[:, :, :HW]
    return out.reshape(N, C, H, W)


def _reference(t, c, w, scale, shift):
    gap = jnp.mean(t, axis=(2, 3))                          # (N, C)
    y = gap @ w.T                                           # (N, C)
    y = y * scale[:, 0][None, :] + shift[:, 0][None, :]
    gate = jax.nn.sigmoid(y)[:, :, None, None]
    return t * gate * c


if __name__ == "__main__":
    key = jax.random.PRNGKey(0)
    k_t, k_c, k_w, k_b, k_g, k_beta, k_m, k_v = jax.random.split(key, 8)

    N, H, W = 2, 16, 16
    t = jax.random.normal(k_t, (N, C, H, W), dtype=jnp.float32)
    c = jax.random.normal(k_c, (N, C, H, W), dtype=jnp.float32)

    # Deterministic synthetic parameters for Conv(128,128,1) + BatchNorm2d(128).
    conv_w = jax.random.normal(k_w, (C, C), dtype=jnp.float32) * 0.05    # (C_out, C_in)
    conv_b = jax.random.normal(k_b, (C,), dtype=jnp.float32) * 0.05
    bn_gamma = 1.0 + 0.1 * jax.random.normal(k_g, (C,), dtype=jnp.float32)
    bn_beta = 0.1 * jax.random.normal(k_beta, (C,), dtype=jnp.float32)
    bn_mean = 0.1 * jax.random.normal(k_m, (C,), dtype=jnp.float32)
    bn_var = jnp.abs(1.0 + 0.1 * jax.random.normal(k_v, (C,), dtype=jnp.float32))
    eps = 1e-5

    # Fold conv bias + BN (eval mode) into per-channel scale/shift:
    #   bn(conv_out) = gamma/sqrt(var+eps) * (W@gap + b - mean) + beta
    scale = (bn_gamma / jnp.sqrt(bn_var + eps)).reshape(C, 1)
    shift = (bn_beta + scale[:, 0] * (conv_b - bn_mean)).reshape(C, 1)

    out = glau_block(t, c, conv_w, scale, shift)
    jax.block_until_ready(out)

    ref = _reference(t, c, conv_w, scale, shift)
    assert jnp.allclose(out, ref, atol=1e-4, rtol=1e-4), "mismatch vs reference"

    print("KERNEL_OK")
</pallas_src>

<mosaic_0001>
module attributes {stable_mosaic.version = 11 : i64} {
  func.func @_glau_kernel(%arg0: i32, %arg1: memref<1x128x256xf32, #tpu.memory_space<vmem>>, %arg2: memref<1x128x256xf32, #tpu.memory_space<vmem>>, %arg3: memref<128x128xf32, #tpu.memory_space<vmem>>, %arg4: memref<1x128xf32, #tpu.memory_space<vmem>>, %arg5: memref<1x128xf32, #tpu.memory_space<vmem>>, %arg6: memref<1x128x256xf32, #tpu.memory_space<vmem>>) attributes {dimension_semantics = [#tpu.dimension_semantics<parallel>], iteration_bounds = array<i64: 2>, scalar_prefetch = 0 : i64, scratch_operands = 0 : i64, tpu.core_type = #tpu.core_type<tc>, window_params = [{transform_indices = @transform_0, window_bounds = array<i64: 1, 128, 256>}, {transform_indices = @transform_1, window_bounds = array<i64: 1, 128, 256>}, {pipeline_mode = #tpu.pipeline_mode<synchronous>, transform_indices = @transform_2, window_bounds = array<i64: 128, 128>}, {pipeline_mode = #tpu.pipeline_mode<synchronous>, transform_indices = @transform_3, window_bounds = array<i64: 1, 128>}, {pipeline_mode = #tpu.pipeline_mode<synchronous>, transform_indices = @transform_4, window_bounds = array<i64: 1, 128>}, {transform_indices = @transform_5, window_bounds = array<i64: 1, 128, 256>}]} {
    %c0 = arith.constant 0 : index
    %c0_0 = arith.constant 0 : index
    %c0_1 = arith.constant 0 : index
    %0 = vector.load %arg1[%c0, %c0_0, %c0_1] : memref<1x128x256xf32, #tpu.memory_space<vmem>>, vector<1x128x256xf32>
    %cst = arith.constant dense<0.000000e+00> : vector<1x128xf32>
    %1 = vector.multi_reduction <add>, %0, %cst [2] : vector<1x128x256xf32> to vector<1x128xf32>
    %c0_2 = arith.constant 0 : index
    %c0_3 = arith.constant 0 : index
    %2 = vector.load %arg3[%c0_2, %c0_3] : memref<128x128xf32, #tpu.memory_space<vmem>>, vector<128x128xf32>
    %cst_4 = arith.constant dense<0.000000e+00> : vector<1x128xf32>
    %3 = tpu.matmul %1, %2, %cst_4 {dimension_numbers = #tpu.dot_dimension_numbers<[1], [0], [0], [1], [0, 0, 1, 1], [], []>} : vector<1x128xf32>, vector<128x128xf32>, vector<1x128xf32> -> vector<1x128xf32>
    %c0_5 = arith.constant 0 : index
    %c0_6 = arith.constant 0 : index
    %4 = vector.load %arg4[%c0_5, %c0_6] : memref<1x128xf32, #tpu.memory_space<vmem>>, vector<1x128xf32>
    %5 = arith.mulf %3, %4 : vector<1x128xf32>
    %c0_7 = arith.constant 0 : index
    %c0_8 = arith.constant 0 : index
    %6 = vector.load %arg5[%c0_7, %c0_8] : memref<1x128xf32, #tpu.memory_space<vmem>>, vector<1x128xf32>
    %7 = arith.addf %5, %6 : vector<1x128xf32>
    %8 = arith.negf %7 : vector<1x128xf32>
    %9 = math.exp %8 : vector<1x128xf32>
    %cst_9 = arith.constant 1.000000e+00 : f32
    %10 = vector.broadcast %cst_9 : f32 to vector<1x128xf32>
    %11 = arith.addf %10, %9 : vector<1x128xf32>
    %12 = arith.divf %10, %11 : vector<1x128xf32>
    %13 = vector.shape_cast %12 : vector<1x128xf32> to vector<1x128x1xf32>
    %c0_10 = arith.constant 0 : index
    %c0_11 = arith.constant 0 : index
    %c0_12 = arith.constant 0 : index
    %14 = vector.load %arg1[%c0_10, %c0_11, %c0_12] : memref<1x128x256xf32, #tpu.memory_space<vmem>>, vector<1x128x256xf32>
    %15 = vector.broadcast %13 : vector<1x128x1xf32> to vector<1x128x256xf32>
    %16 = arith.mulf %14, %15 : vector<1x128x256xf32>
    %c0_13 = arith.constant 0 : index
    %c0_14 = arith.constant 0 : index
    %c0_15 = arith.constant 0 : index
    %17 = vector.load %arg2[%c0_13, %c0_14, %c0_15] : memref<1x128x256xf32, #tpu.memory_space<vmem>>, vector<1x128x256xf32>
    %18 = arith.mulf %16, %17 : vector<1x128x256xf32>
    %c0_16 = arith.constant 0 : index
    %c0_17 = arith.constant 0 : index
    %c0_18 = arith.constant 0 : index
    %19 = vector.load %arg6[%c0_16, %c0_17, %c0_18] : memref<1x128x256xf32, #tpu.memory_space<vmem>>, vector<1x128x256xf32>
    tpu.vector_store %arg6[%c0_16, %c0_17, %c0_18], %18 {strides = array<i32>} : memref<1x128x256xf32, #tpu.memory_space<vmem>>, vector<1x128x256xf32>,
    return
  }
  func.func @transform_0(%arg0: i32) -> (i32, i32, i32) {
    %c0_i32 = arith.constant 0 : i32
    %c0_i32_0 = arith.constant 0 : i32
    %c0_i32_1 = arith.constant 0 : i32
    return %arg0, %c0_i32, %c0_i32_0 : i32, i32, i32
  }
  func.func @transform_1(%arg0: i32) -> (i32, i32, i32) {
    %c0_i32 = arith.constant 0 : i32
    %c0_i32_0 = arith.constant 0 : i32
    %c0_i32_1 = arith.constant 0 : i32
    return %arg0, %c0_i32, %c0_i32_0 : i32, i32, i32
  }
  func.func @transform_2(%arg0: i32) -> (i32, i32) {
    %c0_i32 = arith.constant 0 : i32
    %c0_i32_0 = arith.constant 0 : i32
    %c0_i32_1 = arith.constant 0 : i32
    return %c0_i32, %c0_i32_0 : i32, i32
  }
  func.func @transform_3(%arg0: i32) -> (i32, i32) {
    %c0_i32 = arith.constant 0 : i32
    %c0_i32_0 = arith.constant 0 : i32
    %c0_i32_1 = arith.constant 0 : i32
    return %c0_i32, %c0_i32_0 : i32, i32
  }
  func.func @transform_4(%arg0: i32) -> (i32, i32) {
    %c0_i32 = arith.constant 0 : i32
    %c0_i32_0 = arith.constant 0 : i32
    %c0_i32_1 = arith.constant 0 : i32
    return %c0_i32, %c0_i32_0 : i32, i32
  }
  func.func @transform_5(%arg0: i32) -> (i32, i32, i32) {
    %c0_i32 = arith.constant 0 : i32
    %c0_i32_0 = arith.constant 0 : i32
    %c0_i32_1 = arith.constant 0 : i32
    return %arg0, %c0_i32, %c0_i32_0 : i32, i32, i32
  }
}

</mosaic_0001>

<bundles_post_ra>
// kernel: glau_block.1
= control target key start
LH: loop header
LB: loop body
LE: loop exit
PB: predicated region body
PF: predicated region fallthrough
CT: control target
= control target key end

     0   :  { %s840_s18 = smov 0   ;;  %s1187_s0 = inlined_call_operand.vmem [shape: f32[2,128,256], index: 0, kind: input, shape index: {}]   ;;  %s1188_s1 = inlined_call_operand.vmem [shape: f32[2,128,256], index: 1, kind: input, shape index: {}]   ;;  %s1189_s2 = inlined_call_operand.vmem [shape: f32[128,128], index: 2, kind: input, shape index: {}]   ;;  %s1190_s3 = inlined_call_operand.vmem [shape: f32[1,128], index: 3, kind: input, shape index: {}]   ;;  %s1191_s4 = inlined_call_operand.vmem [shape: f32[1,128], index: 4, kind: input, shape index: {}]   ;;  %s1192_s5 = inlined_call_operand.vmem [shape: f32[2,128,256], index: 5, kind: output, shape index: {}]  }
   0x1 LB: > { %s756_s19 = sadd.s32 4294967295, %s808_s18   ;;  %p760_p0 = scmp.ge.s32.totalorder %s808_s18, 1  ;;  %s808_s18 = sphi %s840_s18, %s15_s18  }
   0x2   : > { %p197_p1 = scmp.lt.s32.totalorder %s808_s18, 3 }
   0x4   : > { %p198_p2 = pnand %p760_p0, %p197_p1 }
   0x5   : > { %p230_p3 = scmp.lt.s32.totalorder (!%p198_p2), %s756_s19, 1 }
   0x6   : > { %201 = sbr.rel (%p198_p2) target bundleno = 538 (0x21a), region = 40 }
   0xb   : > { %s1194_s19 = smov (!%p230_p3, %s756_s19), 1  ;;  %v340_v48 = vld [vmem:[%s1189_s2 + $0x78] sm:$0xff]  ;;  %v339_v49 = vld [vmem:[%s1189_s2 + $0x70] sm:$0xff]  ;;  %v338_v50 = vld [vmem:[%s1189_s2 + $0x68] sm:$0xff]  ;;  %v357_v58 = vlaneseq  ;;  %vm362_vm0 = vcmask 130112   ;;  %vm366_vm1 = vcmask 195712  }
   0xc   : > { %s848_s20 = sshll.u32 %s1194_s19, 8  ;;  %421 = vmatpush.msra.mxu0 %v340_v48  ;;  %v337_v51 = vld [vmem:[%s1189_s2 + $0x60] sm:$0xff]  ;;  %v336_v52 = vld [vmem:[%s1189_s2 + $0x58] sm:$0xff]  ;;  %v335_v53 = vld [vmem:[%s1189_s2 + $0x50] sm:$0xff]  ;;  %vm370_vm2 = vcmask 261312   ;;  %vm374_vm3 = vcmask 326912  }
   0xd   : > { %s854_s23 = scalar_lea.vmem %s1187_s0, %s848_s20  ;;  %v334_v54 = vld [vmem:[%s1189_s2 + $0x48] sm:$0xff]  ;;  %v333_v55 = vld [vmem:[%s1189_s2 + $0x40] sm:$0xff]  ;;  %v332_v56 = vld [vmem:[%s1189_s2 + $0x38] sm:$0xff]  ;;  %vm378_vm4 = vcmask 392512   ;;  %vm382_vm5 = vcmask 458112   ;;  %vm386_vm6 = vcmask 523712   ;;  %s1080_s14 = scalar_lea.vmem %s1188_s1, %s848_s20 }
   0xe   : > { %v857_v0 = vld [vmem:[%s854_s23] sm:$0xff]  ;;  %v860_v1 = vld [vmem:[%s854_s23 + $0x8] sm:$0xff]  ;;  %v881_v9 = vld [vmem:[%s854_s23 + $0x10] sm:$0xff]  ;;  %422 = vmatpush.msra.mxu0 %v339_v49  ;;  %vm390_vm7 = vcmask 589312   ;;  %vm394_vm8 = vcmask 654912   ;;  %vm398_vm9 = vcmask 720512   ;;  %s1090_s17 = scalar_lea.vmem %s1192_s5, %s848_s20 }
   0xf   : > { %v863_v2 = vld [vmem:[%s854_s23 + $0x20] sm:$0xff]  ;;  %v277_v3 = vadd.f32 %v860_v1, %v857_v0  ;;  %v868_v4 = vld [vmem:[%s854_s23 + $0x28] sm:$0xff]  ;;  %v884_v10 = vld [vmem:[%s854_s23 + $0x18] sm:$0xff]  ;;  %vm402_vm10 = vcmask 786112   ;;  %vm406_vm11 = vcmask 851712   ;;  %vm410_vm12 = vcmask 917312  }
  0x10   : > { %v871_v5 = vld [vmem:[%s854_s23 + $0x40] sm:$0xff]  ;;  %v874_v6 = vld [vmem:[%s854_s23 + $0x48] sm:$0xff]  ;;  %v283_v7 = vadd.f32 %v868_v4, %v863_v2  ;;  %v887_v11 = vld [vmem:[%s854_s23 + $0x30] sm:$0xff]  ;;  %v280_v15 = vadd.f32 %v884_v10, %v881_v9  ;;  %423 = vmatpush.msra.mxu0 %v338_v50  ;;  %vm414_vm13 = vcmask 982912   ;;  %vm418_vm14 = vcmask 1048512  }
  0x11   : > { %v289_v8 = vadd.f32 %v874_v6, %v871_v5  ;;  %278 = vadd.xlane.f32.xlu0 %v277_v3  ;;  %v890_v12 = vld [vmem:[%s854_s23 + $0x38] sm:$0xff]  ;;  %v893_v13 = vld [vmem:[%s854_s23 + $0x50] sm:$0xff]  ;;  %v905_v18 = vld [vmem:[%s854_s23 + $0x60] sm:$0xff]  ;;  %v1021_v3 = vand.u32 127, %v357_v58 }
  0x12   : > { %284 = vadd.xlane.f32.xlu1 %v283_v7  ;;  %v896_v14 = vld [vmem:[%s854_s23 + $0x58] sm:$0xff]  ;;  %v286_v16 = vadd.f32 %v890_v12, %v887_v11  ;;  %v908_v19 = vld [vmem:[%s854_s23 + $0x68] sm:$0xff]  ;;  %v911_v20 = vld [vmem:[%s854_s23 + $0x70] sm:$0xff]  ;;  %424 = vmatpush.msra.mxu0 %v337_v51 }
  0x13   : > { %290 = vadd.xlane.f32.xlu2 %v289_v8  ;;  %v292_v17 = vadd.f32 %v896_v14, %v893_v13  ;;  %v914_v21 = vld [vmem:[%s854_s23 + $0x78] sm:$0xff]  ;;  %v917_v22 = vld [vmem:[%s854_s23 + $0x80] sm:$0xff]  ;;  %v920_v23 = vld [vmem:[%s854_s23 + $0x88] sm:$0xff]  ;;  %v295_v24 = vadd.f32 %v908_v19, %v905_v18  ;;  %v372_v48 = vadd.s32 4294967264, %v1021_v3  ;;  %v376_v50 = vadd.s32 4294967256, %v1021_v3 }
  0x14   : > { %v298_v25 = vadd.f32 %v914_v21, %v911_v20  ;;  %v301_v26 = vadd.f32 %v920_v23, %v917_v22  ;;  %v929_v27 = vld [vmem:[%s854_s23 + $0x90] sm:$0xff]  ;;  %v932_v28 = vld [vmem:[%s854_s23 + $0x98] sm:$0xff]  ;;  %v935_v29 = vld [vmem:[%s854_s23 + $0xa0] sm:$0xff]  ;;  %425 = vmatpush.msra.mxu0 %v336_v52  ;;  %v380_v51 = vadd.s32 4294967248, %v1021_v3 }
  0x15   : > { %v938_v30 = vld [vmem:[%s854_s23 + $0xa8] sm:$0xff]  ;;  %v941_v31 = vld [vmem:[%s854_s23 + $0xb0] sm:$0xff]  ;;  %v944_v32 = vld [vmem:[%s854_s23 + $0xb8] sm:$0xff]  ;;  %v304_v33 = vadd.f32 %v932_v28, %v929_v27 }
  0x16   : > { %v307_v34 = vadd.f32 %v938_v30, %v935_v29  ;;  %v310_v35 = vadd.f32 %v944_v32, %v941_v31  ;;  %v953_v36 = vld [vmem:[%s854_s23 + $0xc0] sm:$0xff]  ;;  %v956_v37 = vld [vmem:[%s854_s23 + $0xc8] sm:$0xff]  ;;  %v959_v38 = vld [vmem:[%s854_s23 + $0xd0] sm:$0xff]  ;;  %426 = vmatpush.msra.mxu0 %v335_v53 }
  0x17   : > { %v962_v39 = vld [vmem:[%s854_s23 + $0xd8] sm:$0xff]  ;;  %v965_v40 = vld [vmem:[%s854_s23 + $0xe0] sm:$0xff]  ;;  %v968_v41 = vld [vmem:[%s854_s23 + $0xe8] sm:$0xff]  ;;  %v313_v42 = vadd.f32 %v956_v37, %v953_v36 }
  0x18   : > { %v316_v43 = vadd.f32 %v962_v39, %v959_v38  ;;  %v319_v44 = vadd.f32 %v968_v41, %v965_v40  ;;  %v977_v45 = vld [vmem:[%s854_s23 + $0xf0] sm:$0xff]  ;;  %v980_v46 = vld [vmem:[%s854_s23 + $0xf8] sm:$0xff]  ;;  %427 = vmatpush.msra.mxu0 %v334_v54  ;;  %v330_v60 = vld [vmem:[%s1189_s2 + $0x28] sm:$0xff] }
  0x19   : > { %281 = vadd.xlane.f32.xlu0 %v280_v15  ;;  %v322_v47 = vadd.f32 %v980_v46, %v977_v45  ;;  %v331_v57 = vld [vmem:[%s1189_s2 + $0x30] sm:$0xff]  ;;  %v329_v63 = vld [vmem:[%s1189_s2 + $0x20] sm:$0xff]  ;;  %v328_v7 = vld [vmem:[%s1189_s2 + $0x18] sm:$0xff]  ;;  %v360_v15 = vadd.s32 4294967288, %v1021_v3 }
  0x1a   : > { %287 = vadd.xlane.f32.xlu1 %v286_v16  ;;  %428 = vmatpush.msra.mxu0 %v333_v55  ;;  %v327_v8 = vld [vmem:[%s1189_s2 + $0x10] sm:$0xff]  ;;  %v364_v16 = vadd.s32 4294967280, %v1021_v3 }
  0x1b   : > { %293 = vadd.xlane.f32.xlu2 %v292_v17  ;;  %v368_v17 = vadd.s32 4294967272, %v1021_v3 }
  0x1c   : > { %429 = vmatpush.msra.mxu0 %v332_v56  ;;  %v384_v56 = vadd.s32 4294967240, %v1021_v3 }
  0x1e   : > { %430 = vmatpush.msra.mxu0 %v331_v57 }
  0x20   : > { %431 = vmatpush.msra.mxu0 %v330_v60 }
  0x21   : > { %296 = vadd.xlane.f32.xlu0 %v295_v24 }
  0x22   : > { %299 = vadd.xlane.f32.xlu1 %v298_v25  ;;  %432 = vmatpush.msra.mxu0 %v329_v63  ;;  %v326_v25 = vld [vmem:[%s1189_s2 + $0x8] sm:$0xff]  ;;  %v388_v63 = vadd.s32 4294967232, %v1021_v3 }
  0x23   : > { %302 = vadd.xlane.f32.xlu2 %v301_v26 }
  0x24   : > { %433 = vmatpush.msra.mxu0 %v328_v7 }
  0x26   : > { %434 = vmatpush.msra.mxu0 %v327_v8 }
  0x28   : > { %435 = vmatpush.msra.mxu0 %v326_v25 }
  0x29   : > { %305 = vadd.xlane.f32.xlu0 %v304_v33 }
  0x2a   : > { %308 = vadd.xlane.f32.xlu1 %v307_v34 }
  0x2b   : > { %311 = vadd.xlane.f32.xlu2 %v310_v35 }
  0x31   : > { %314 = vadd.xlane.f32.xlu0 %v313_v42  ;;  %v325_v42 = vld [vmem:[%s1189_s2] sm:$0xff] }
  0x32   : > { %317 = vadd.xlane.f32.xlu1 %v316_v43  ;;  %436 = vmatpush.msra.mxu0 %v325_v42 }
  0x33   : > { %320 = vadd.xlane.f32.xlu2 %v319_v44 }
  0x39   : > { %323 = vadd.xlane.f32.xlu0 %v322_v47 }
  0x84   : > { %v279_v59 = vpop.xlane.xlu0 %278 }
  0x85   : > { %v285_v61 = vpop.xlane.xlu1 %284  ;;  %v359_v26 = vperm.slane %v279_v59, %v1021_v3 }
  0x86   : > { %v291_v62 = vpop.xlane.xlu2 %290  ;;  %v365_v43 = vperm.slane %v285_v61, %v364_v16 }
  0x87   : > { %v373_v53 = vperm.slane %v291_v62, %v372_v48 }
  0x8c   : > { %v282_v24 = vpop.xlane.xlu0 %281 }
  0x8d   : > { %v361_v33 = vperm.slane %v282_v24, %v360_v15  ;;  %v288_v34 = vpop.xlane.xlu1 %287  ;;  %v392_v15 = vadd.s32 4294967224, %v1021_v3  ;;  %v396_v24 = vadd.s32 4294967216, %v1021_v3 }
  0x8e   : > { %v294_v35 = vpop.xlane.xlu2 %293  ;;  %v369_v47 = vperm.slane %v288_v34, %v368_v17 }
  0x8f   : > { %v363_v44 = vsel %vm362_vm0, %v361_v33, %v359_v26  ;;  %v377_v55 = vperm.slane %v294_v35, %v376_v50  ;;  %v400_v35 = vadd.s32 4294967208, %v1021_v3 }
  0x90   : > { %v367_v49 = vsel %vm366_vm1, %v365_v43, %v363_v44 }
  0x91   : > { %v371_v52 = vsel %vm370_vm2, %v369_v47, %v367_v49  ;;  %v404_v47 = vadd.s32 4294967200, %v1021_v3  ;;  %v408_v49 = vadd.s32 4294967192, %v1021_v3 }
  0x92   : > { %v375_v60 = vsel %vm374_vm3, %v373_v53, %v371_v52 }
  0x93   : > { %v379_v7 = vsel %vm378_vm4, %v377_v55, %v375_v60  ;;  %v416_v60 = vadd.s32 4294967176, %v1021_v3 }
  0x94   : > { %v297_v54 = vpop.xlane.xlu0 %296 }
  0x95   : > { %v300_v57 = vpop.xlane.xlu1 %299  ;;  %v381_v61 = vperm.slane %v297_v54, %v380_v51  ;;  %v412_v54 = vadd.s32 4294967184, %v1021_v3  ;;  %v441_v3 = vld [vmem:[%s1190_s3] sm:$0x1] }
  0x96   : > { %v303_v59 = vpop.xlane.xlu2 %302  ;;  %v385_v8 = vperm.slane %v300_v57, %v384_v56 }
  0x97   : > { %v383_v16 = vsel %vm382_vm5, %v381_v61, %v379_v7  ;;  %v389_v17 = vperm.slane %v303_v59, %v388_v63 }
  0x98   : > { %v387_v25 = vsel %vm386_vm6, %v385_v8, %v383_v16 }
  0x99   : > { %v391_v42 = vsel %vm390_vm7, %v389_v17, %v387_v25  ;;  %v1052_v17 = vshrl.u32 %v357_v58, 7 }
  0x9b   : > { %781 = vset.pattern.permute.xlu1 %v1052_v17 }
  0x9c   : > { %v306_v62 = vpop.xlane.xlu0 %305 }
  0x9d   : > { %v393_v26 = vperm.slane %v306_v62, %v392_v15  ;;  %v309_v33 = vpop.xlane.xlu1 %308  ;;  %v479_v62 = vadd.s32 16, %v1052_v17 }
  0x9e   : > { %v312_v34 = vpop.xlane.xlu2 %311  ;;  %v397_v43 = vperm.slane %v309_v33, %v396_v24  ;;  %v473_v24 = vadd.s32 8, %v1052_v17 }
  0x9f   : > { %v395_v44 = vsel %vm394_vm8, %v393_v26, %v391_v42  ;;  %v401_v48 = vperm.slane %v312_v34, %v400_v35  ;;  %783 = vset.pattern.permute.xlu0 %v479_v62  ;;  %v443_v26 = vld [vmem:[%s1191_s4] sm:$0x1]  ;;  %v533_v62 = vadd.s32 88, %v1052_v17 }
  0xa0   : > { %v399_v50 = vsel %vm398_vm9, %v397_v43, %v395_v44  ;;  %782 = vset.pattern.permute.xlu2 %v473_v24  ;;  %v539_v24 = vadd.s32 96, %v1052_v17 }
  0xa1   : > { %v403_v55 = vsel %vm402_vm10, %v401_v48, %v399_v50 }
  0xa4   : > { %v315_v51 = vpop.xlane.xlu0 %314 }
  0xa5   : > { %v405_v52 = vperm.slane %v315_v51, %v404_v47  ;;  %v318_v53 = vpop.xlane.xlu1 %317 }
  0xa6   : > { %v409_v56 = vperm.slane %v318_v53, %v408_v49  ;;  %v321_v57 = vpop.xlane.xlu2 %320 }
  0xa7   : > { %v407_v59 = vsel %vm406_vm11, %v405_v52, %v403_v55  ;;  %v413_v61 = vperm.slane %v321_v57, %v412_v54  ;;  %v485_v57 = vadd.s32 24, %v1052_v17 }
  0xa8   : > { %v411_v63 = vsel %vm410_vm12, %v409_v56, %v407_v59  ;;  %v521_v56 = vadd.s32 72, %v1052_v17  ;;  %v491_v59 = vadd.s32 32, %v1052_v17 }
  0xa9   : > { %v415_v15 = vsel %vm414_vm13, %v413_v61, %v411_v63  ;;  %v497_v61 = vadd.s32 40, %v1052_v17  ;;  %v503_v63 = vadd.s32 48, %v1052_v17 }
  0xac   : > { %v324_v7 = vpop.xlane.xlu0 %323 }
  0xad   : > { %v417_v8 = vperm.slane %v324_v7, %v416_v60  ;;  %v551_v60 = vadd.s32 112, %v1052_v17  ;;  %v509_v7 = vadd.s32 56, %v1052_v17 }
  0xaf   : > { %v419_v16 = vsel %vm418_vm14, %v417_v8, %v415_v15  ;;  %v515_v8 = vadd.s32 64, %v1052_v17  ;;  %v557_v15 = vadd.s32 120, %v1052_v17 }
  0xb0   : > { %437 = vmatmul.f32.vlgmr.msra.gmra.mxu0 %v419_v16  ;;  %v527_v16 = vadd.s32 80, %v1052_v17 }
 0x12d   : > { %v438_v25 = vpop.f32.mrf.mxu0 }
 0x12e   : > { %v442_v33 = vmul.f32 %v441_v3, %v438_v25  ;;  %v545_v3 = vadd.s32 104, %v1052_v17  ;;  %v595_v25 = vld [vmem:[%s1080_s14 + $0x10] sm:$0xff] }
 0x130   : > { %v444_v58 = vadd.f32 %v443_v26, %v442_v33  ;;  %v596_v26 = vld [vmem:[%s1080_s14 + $0x18] sm:$0xff] }
 0x132   : > { %v767_v34 = vmul.f32 -1.442695, %v444_v58 }
 0x134   : > { %798 = vpow2.f32 %v767_v34 }
 0x13a   : > { %v799_v35 = vpop.eup %798 }
 0x13b   : > { %v448_v42 = vadd.f32 1.0, %v799_v35 }
 0x13d   : > { %800 = vrcp.f32 %v448_v42  ;;  %v460_v48 = vand.u32 2147483648, %v448_v42  ;;  %v458_v50 = vand.u32 2147483647, %v448_v42  ;;  %vm454_vm0 = vweird.f32 %v448_v42 }
 0x13f   : > { %v461_v52 = vor.u32 1.1754944e-38, %v460_v48  ;;  %vm459_vm2 = vcmp.eq.f32.partialorder %v458_v50, 8.507059e+37  ;;  %v598_v50 = vld [vmem:[%s1080_s14 + $0x28] sm:$0xff] }
 0x143   : > { %v801_v43 = vpop.eup %800 }
 0x144   : > { %v450_v44 = vmul.f32 %v801_v43, %v448_v42  ;;  %vm455_vm15 = vweird.f32 %v801_v43 }
 0x145   : > { %vm456_vm1 = vmor %vm454_vm0, %vm455_vm15 }
 0x146   : > { %v451_v47 = vsub.f32 1.0, %v450_v44 }
 0x148   : > { %v452_v49 = vmul.f32 %v801_v43, %v451_v47 }
 0x14a   : > { %v453_v51 = vadd.f32 %v801_v43, %v452_v49  ;;  %v597_v49 = vld [vmem:[%s1080_s14 + $0x20] sm:$0xff] }
 0x14c   : > { %v457_v53 = vsel %vm456_vm1, %v801_v43, %v453_v51 }
 0x14d   : > { %v462_v54 = vsel %vm459_vm2, %v461_v52, %v457_v53 }
 0x14e   : > { %v464_v55 = vperm.slane %v462_v54, 0  ;;  %v594_v54 = vld [vmem:[%s1080_s14 + $0x8] sm:$0xff] }
 0x150   : > { %481 = vperm.xlu0 %783, %v464_v55   ;;  %475 = vperm.xlu2 %782, %v464_v55  }
 0x151   : > { %469 = vperm.xlu1 %781, %v464_v55  }
 0x158   : > { %790 = vset.pattern.permute.xlu0 %v521_v56  ;;  %784 = vset.pattern.permute.xlu2 %v485_v57 }
 0x159   : > { %785 = vset.pattern.permute.xlu1 %v491_v59 }
 0x160   : > { %523 = vperm.xlu0 %790, %v464_v55   ;;  %487 = vperm.xlu2 %784, %v464_v55  }
 0x161   : > { %493 = vperm.xlu1 %785, %v464_v55  }
 0x168   : > { %795 = vset.pattern.permute.xlu0 %v551_v60  ;;  %786 = vset.pattern.permute.xlu2 %v497_v61 }
 0x169   : > { %787 = vset.pattern.permute.xlu1 %v503_v63 }
 0x170   : > { %553 = vperm.xlu0 %795, %v464_v55   ;;  %499 = vperm.xlu2 %786, %v464_v55  }
 0x171   : > { %505 = vperm.xlu1 %787, %v464_v55  }
 0x178   : > { %788 = vset.pattern.permute.xlu2 %v509_v7  ;;  %797 = vset.pattern.permute.xlu0 %v557_v15 }
 0x179   : > { %789 = vset.pattern.permute.xlu1 %v515_v8 }
 0x180   : > { %511 = vperm.xlu2 %788, %v464_v55  }
 0x181   : > { %517 = vperm.xlu1 %789, %v464_v55  }
 0x188   : > { %791 = vset.pattern.permute.xlu2 %v527_v16  ;;  %v612_v16 = vld [vmem:[%s1080_s14 + $0x98] sm:$0xff] }
 0x189   : > { %792 = vset.pattern.permute.xlu1 %v533_v62 }
 0x190   : > { %529 = vperm.xlu2 %791, %v464_v55  }
 0x191   : > { %535 = vperm.xlu1 %792, %v464_v55  }
 0x198   : > { %793 = vset.pattern.permute.xlu2 %v539_v24 }
 0x199   : > { %794 = vset.pattern.permute.xlu1 %v545_v3 }
 0x1a0   : > { %541 = vperm.xlu2 %793, %v464_v55  }
 0x1a1   : > { %547 = vperm.xlu1 %794, %v464_v55  }
 0x1a8   : > { %796 = vset.pattern.permute.xlu2 %v557_v15  ;;  %v611_v15 = vld [vmem:[%s1080_s14 + $0x90] sm:$0xff] }
 0x1aa   : > { %v476_v33 = vpop.permute.xlu2 %475 }
 0x1ab   : > { %v563_v58 = vmul.f32 %v476_v33, %v881_v9  ;;  %v564_v17 = vmul.f32 %v476_v33, %v884_v10  ;;  %v599_v9 = vld [vmem:[%s1080_s14 + $0x30] sm:$0xff]  ;;  %v600_v10 = vld [vmem:[%s1080_s14 + $0x38] sm:$0xff] }
 0x1ad   : > { %v627_v34 = vmul.f32 %v595_v25, %v563_v58  ;;  %v628_v35 = vmul.f32 %v596_v26, %v564_v17  ;;  %v602_v25 = vld [vmem:[%s1080_s14 + $0x48] sm:$0xff] }
 0x1af   : > { %659 = vst [vmem:[%s1090_s17 + $0x10] sm:$0xff] %v627_v34 }
 0x1b0   : > { %660 = vst [vmem:[%s1090_s17 + $0x18] sm:$0xff] %v628_v35  ;;  %559 = vperm.xlu2 %796, %v464_v55  }
 0x1ba   : > { %v488_v42 = vpop.permute.xlu2 %487 }
 0x1bb   : > { %v567_v43 = vmul.f32 %v488_v42, %v887_v11  ;;  %v568_v44 = vmul.f32 %v488_v42, %v890_v12  ;;  %v593_v11 = vld [vmem:[%s1080_s14] sm:$0xff] }
 0x1bd   : > { %v631_v47 = vmul.f32 %v599_v9, %v567_v43  ;;  %v632_v48 = vmul.f32 %v600_v10, %v568_v44  ;;  %v621_v43 = vld [vmem:[%s1080_s14 + $0xe0] sm:$0xff]  ;;  %v622_v44 = vld [vmem:[%s1080_s14 + $0xe8] sm:$0xff] }
 0x1bf   : > { %663 = vst [vmem:[%s1090_s17 + $0x30] sm:$0xff] %v631_v47 }
 0x1c0   : > { %664 = vst [vmem:[%s1090_s17 + $0x38] sm:$0xff] %v632_v48 }
 0x1c2   : > { %v482_v51 = vpop.permute.xlu0 %481 }
 0x1c3   : > { %v565_v52 = vmul.f32 %v482_v51, %v863_v2  ;;  %v566_v53 = vmul.f32 %v482_v51, %v868_v4  ;;  %v470_v12 = vpop.permute.xlu1 %469  ;;  %v603_v2 = vld [vmem:[%s1080_s14 + $0x50] sm:$0xff]  ;;  %v604_v4 = vld [vmem:[%s1080_s14 + $0x58] sm:$0xff] }
 0x1c4   : > { %v561_v55 = vmul.f32 %v470_v12, %v857_v0  ;;  %v562_v56 = vmul.f32 %v470_v12, %v860_v1 }
 0x1c5   : > { %v629_v57 = vmul.f32 %v597_v49, %v565_v52  ;;  %v630_v59 = vmul.f32 %v598_v50, %v566_v53  ;;  %v606_v50 = vld [vmem:[%s1080_s14 + $0x68] sm:$0xff] }
 0x1c6   : > { %v625_v60 = vmul.f32 %v593_v11, %v561_v55  ;;  %v626_v61 = vmul.f32 %v594_v54, %v562_v56 }
 0x1c7   : > { %661 = vst [vmem:[%s1090_s17 + $0x20] sm:$0xff] %v629_v57 }
 0x1c8   : > { %662 = vst [vmem:[%s1090_s17 + $0x28] sm:$0xff] %v630_v59  ;;  %v609_v59 = vld [vmem:[%s1080_s14 + $0x80] sm:$0xff] }
 0x1c9   : > { %657 = vst [vmem:[%s1090_s17] sm:$0xff] %v625_v60  ;;  %v610_v60 = vld [vmem:[%s1080_s14 + $0x88] sm:$0xff] }
 0x1ca   : > { %658 = vst [vmem:[%s1090_s17 + $0x8] sm:$0xff] %v626_v61  ;;  %v500_v63 = vpop.permute.xlu2 %499 }
 0x1cb   : > { %v571_v0 = vmul.f32 %v500_v63, %v893_v13  ;;  %v572_v1 = vmul.f32 %v500_v63, %v896_v14  ;;  %v601_v13 = vld [vmem:[%s1080_s14 + $0x40] sm:$0xff] }
 0x1cd   : > { %v635_v7 = vmul.f32 %v603_v2, %v571_v0  ;;  %v636_v8 = vmul.f32 %v604_v4, %v572_v1  ;;  %v618_v0 = vld [vmem:[%s1080_s14 + $0xc8] sm:$0xff] }
 0x1cf   : > { %667 = vst [vmem:[%s1090_s17 + $0x50] sm:$0xff] %v635_v7 }
 0x1d0   : > { %668 = vst [vmem:[%s1090_s17 + $0x58] sm:$0xff] %v636_v8 }
 0x1d2   : > { %v524_v62 = vpop.permute.xlu0 %523 }
 0x1d3   : > { %v579_v24 = vmul.f32 %v524_v62, %v929_v27  ;;  %v580_v3 = vmul.f32 %v524_v62, %v932_v28  ;;  %v494_v14 = vpop.permute.xlu1 %493  ;;  %v607_v27 = vld [vmem:[%s1080_s14 + $0x70] sm:$0xff]  ;;  %v608_v28 = vld [vmem:[%s1080_s14 + $0x78] sm:$0xff] }
 0x1d4   : > { %v569_v26 = vmul.f32 %v494_v14, %v871_v5  ;;  %v570_v33 = vmul.f32 %v494_v14, %v874_v6 }
 0x1d5   : > { %v643_v58 = vmul.f32 %v611_v15, %v579_v24  ;;  %v644_v17 = vmul.f32 %v612_v16, %v580_v3  ;;  %v616_v16 = vld [vmem:[%s1080_s14 + $0xb8] sm:$0xff] }
 0x1d6   : > { %v633_v34 = vmul.f32 %v601_v13, %v569_v26  ;;  %v634_v35 = vmul.f32 %v602_v25, %v570_v33  ;;  %v624_v25 = vld [vmem:[%s1080_s14 + $0xf8] sm:$0xff] }
 0x1d7   : > { %675 = vst [vmem:[%s1090_s17 + $0x90] sm:$0xff] %v643_v58 }
 0x1d8   : > { %676 = vst [vmem:[%s1090_s17 + $0x98] sm:$0xff] %v644_v17 }
 0x1d9   : > { %665 = vst [vmem:[%s1090_s17 + $0x40] sm:$0xff] %v633_v34  ;;  %v620_v34 = vld [vmem:[%s1080_s14 + $0xd8] sm:$0xff] }
 0x1da   : > { %666 = vst [vmem:[%s1090_s17 + $0x48] sm:$0xff] %v634_v35  ;;  %v512_v9 = vpop.permute.xlu2 %511 }
 0x1db   : > { %v575_v5 = vmul.f32 %v512_v9, %v911_v20  ;;  %v576_v6 = vmul.f32 %v512_v9, %v914_v21  ;;  %v605_v20 = vld [vmem:[%s1080_s14 + $0x60] sm:$0xff] }
 0x1dd   : > { %v639_v10 = vmul.f32 %v607_v27, %v575_v5  ;;  %v640_v42 = vmul.f32 %v608_v28, %v576_v6 }
 0x1df   : > { %671 = vst [vmem:[%s1090_s17 + $0x70] sm:$0xff] %v639_v10 }
 0x1e0   : > { %672 = vst [vmem:[%s1090_s17 + $0x78] sm:$0xff] %v640_v42 }
 0x1e2   : > { %v554_v47 = vpop.permute.xlu0 %553 }
 0x1e3   : > { %v589_v48 = vmul.f32 %v554_v47, %v965_v40  ;;  %v590_v49 = vmul.f32 %v554_v47, %v968_v41  ;;  %v506_v21 = vpop.permute.xlu1 %505  ;;  %v613_v40 = vld [vmem:[%s1080_s14 + $0xa0] sm:$0xff]  ;;  %v614_v41 = vld [vmem:[%s1080_s14 + $0xa8] sm:$0xff] }
 0x1e4   : > { %v573_v51 = vmul.f32 %v506_v21, %v905_v18  ;;  %v574_v52 = vmul.f32 %v506_v21, %v908_v19 }
 0x1e5   : > { %v653_v53 = vmul.f32 %v621_v43, %v589_v48  ;;  %v654_v11 = vmul.f32 %v622_v44, %v590_v49 }
 0x1e6   : > { %v637_v54 = vmul.f32 %v605_v20, %v573_v51  ;;  %v638_v12 = vmul.f32 %v606_v50, %v574_v52 }
 0x1e7   : > { %685 = vst [vmem:[%s1090_s17 + $0xe0] sm:$0xff] %v653_v53 }
 0x1e8   : > { %686 = vst [vmem:[%s1090_s17 + $0xe8] sm:$0xff] %v654_v11 }
 0x1e9   : > { %669 = vst [vmem:[%s1090_s17 + $0x60] sm:$0xff] %v637_v54 }
 0x1ea   : > { %670 = vst [vmem:[%s1090_s17 + $0x68] sm:$0xff] %v638_v12  ;;  %v530_v55 = vpop.permute.xlu2 %529 }
 0x1eb   : > { %v581_v18 = vmul.f32 %v530_v55, %v935_v29  ;;  %v582_v19 = vmul.f32 %v530_v55, %v938_v30  ;;  %v617_v30 = vld [vmem:[%s1080_s14 + $0xc0] sm:$0xff] }
 0x1ed   : > { %v645_v56 = vmul.f32 %v613_v40, %v581_v18  ;;  %v646_v57 = vmul.f32 %v614_v41, %v582_v19 }
 0x1ef   : > { %677 = vst [vmem:[%s1090_s17 + $0xa0] sm:$0xff] %v645_v56 }
 0x1f0   : > { %678 = vst [vmem:[%s1090_s17 + $0xa8] sm:$0xff] %v646_v57 }
 0x1f3   : > { %v518_v61 = vpop.permute.xlu1 %517 }
 0x1f4   : > { %v577_v2 = vmul.f32 %v518_v61, %v917_v22  ;;  %v578_v4 = vmul.f32 %v518_v61, %v920_v23  ;;  %v615_v23 = vld [vmem:[%s1080_s14 + $0xb0] sm:$0xff] }
 0x1f6   : > { %v641_v63 = vmul.f32 %v609_v59, %v577_v2  ;;  %v642_v29 = vmul.f32 %v610_v60, %v578_v4 }
 0x1f8   : > { %673 = vst [vmem:[%s1090_s17 + $0x80] sm:$0xff] %v641_v63 }
 0x1f9   : > { %674 = vst [vmem:[%s1090_s17 + $0x88] sm:$0xff] %v642_v29 }
 0x1fa   : > { %v542_v1 = vpop.permute.xlu2 %541 }
 0x1fb   : > { %v585_v7 = vmul.f32 %v542_v1, %v953_v36  ;;  %v586_v8 = vmul.f32 %v542_v1, %v956_v37  ;;  %v623_v37 = vld [vmem:[%s1080_s14 + $0xf0] sm:$0xff] }
 0x1fd   : > { %v649_v15 = vmul.f32 %v617_v30, %v585_v7  ;;  %v650_v22 = vmul.f32 %v618_v0, %v586_v8 }
 0x1ff   : > { %681 = vst [vmem:[%s1090_s17 + $0xc0] sm:$0xff] %v649_v15 }
 0x200   : > { %682 = vst [vmem:[%s1090_s17 + $0xc8] sm:$0xff] %v650_v22 }
 0x203   : > { %v536_v62 = vpop.permute.xlu1 %535 }
 0x204   : > { %v583_v24 = vmul.f32 %v536_v62, %v941_v31  ;;  %v584_v3 = vmul.f32 %v536_v62, %v944_v32  ;;  %v619_v31 = vld [vmem:[%s1080_s14 + $0xd0] sm:$0xff] }
 0x206   : > { %v647_v13 = vmul.f32 %v615_v23, %v583_v24  ;;  %v648_v36 = vmul.f32 %v616_v16, %v584_v3 }
 0x208   : > { %679 = vst [vmem:[%s1090_s17 + $0xb0] sm:$0xff] %v647_v13 }
 0x209   : > { %680 = vst [vmem:[%s1090_s17 + $0xb8] sm:$0xff] %v648_v36 }
 0x20a   : > { %v560_v14 = vpop.permute.xlu2 %559 }
 0x20b   : > { %v591_v26 = vmul.f32 %v560_v14, %v977_v45  ;;  %v592_v33 = vmul.f32 %v560_v14, %v980_v46 }
 0x20d   : > { %v655_v58 = vmul.f32 %v623_v37, %v591_v26  ;;  %v656_v17 = vmul.f32 %v624_v25, %v592_v33 }
 0x20f   : > { %687 = vst [vmem:[%s1090_s17 + $0xf0] sm:$0xff] %v655_v58 }
 0x210   : > { %688 = vst [vmem:[%s1090_s17 + $0xf8] sm:$0xff] %v656_v17 }
 0x213   : > { %v548_v32 = vpop.permute.xlu1 %547 }
 0x214   : > { %v587_v35 = vmul.f32 %v548_v32, %v959_v38  ;;  %v588_v27 = vmul.f32 %v548_v32, %v962_v39 }
 0x216   : > { %v651_v28 = vmul.f32 %v619_v31, %v587_v35  ;;  %v652_v9 = vmul.f32 %v620_v34, %v588_v27 }
 0x218   : > { %683 = vst [vmem:[%s1090_s17 + $0xd0] sm:$0xff] %v651_v28 }
 0x219   : > { %684 = vst [vmem:[%s1090_s17 + $0xd8] sm:$0xff] %v652_v9 }
 0x21a PF: > { %s15_s18 = sadd.s32 1, %s808_s18  }
 0x21b   : > { %p12_p4 = scmp.ge.s32.totalorder %s15_s18, 4  }
 0x21d   :  { %14 = sbr.rel (!%p12_p4) target bundleno = 1 (0x1), region = 73 }

</bundles_post_ra>
